<compile_context>
chip_gen: v6e
topology: v6e:2x2x1
jax: 0.10.0
libtpu: 0.0.40
codegen_flags: <defaults>
</compile_context>

<pallas_src>
import math

import jax
import jax.numpy as jnp
from jax.experimental import pallas as pl
from jax.experimental.pallas import tpu as pltpu


# ---------------------------------------------------------------------------
# Pallas kernels
# ---------------------------------------------------------------------------

def _matmul_bias_kernel(x_ref, w_ref, b_ref, o_ref):
    """One grid step = one MXU dot over the full K with a bias epilogue.

    W and b have constant index_maps (VMEM-resident across the M grid), so
    there is no K reduction axis, no accumulator scratch and no pl.when."""
    acc = jnp.dot(x_ref[...], w_ref[...], preferred_element_type=jnp.float32)
    o_ref[...] = (acc + b_ref[...]).astype(o_ref.dtype)


def _round_up(v, m):
    return (v + m - 1) // m * m


def _choose_tm(m, default=256):
    """Pick the M tile: >=2 parallel blocks when possible (v7x megacore),
    sublane-aligned, never larger than M."""
    if m <= 16:
        return m                          # full extent; too small to split
    if m <= 2 * default:
        return min(m, _round_up(pl.cdiv(m, 2), 16))
    return default


def pallas_matmul_bias(x, w, b):
    """x:(M,K) bf16 @ w:(K,N) bf16 + b:(1,N) f32 -> (M,N) bf16.

    Weight-resident / full-N plan: grid=(cdiv(M,tm),), x blocks (tm,K),
    W and bias full-extent with constant index_maps, bf16 output."""
    M, K = x.shape
    N = w.shape[1]
    tm = _choose_tm(M)

    def footprint(tm_):
        # resident W + bias, double-buffered x tile, double-buffered out tile
        return (w.size * 2 + b.size * 4
                + 2 * tm_ * K * 2 + 2 * tm_ * N * 2 + (2 << 20))

    while footprint(tm) > (40 << 20) and tm > 64:
        tm = max(64, tm // 2)
    # Raise v5e's 16 MiB default scoped limit; stay well under v7x's 64 MiB.
    vmem_limit = int(min(max(footprint(tm), 32 << 20), 48 << 20))

    grid_m = pl.cdiv(M, tm)
    return pl.pallas_call(
        _matmul_bias_kernel,
        out_shape=jax.ShapeDtypeStruct((M, N), jnp.bfloat16),
        grid=(grid_m,),
        in_specs=[
            pl.BlockSpec((tm, K), lambda i: (i, 0)),
            pl.BlockSpec((K, N), lambda i: (0, 0)),   # resident weight
            pl.BlockSpec((1, N), lambda i: (0, 0)),   # resident bias
        ],
        out_specs=pl.BlockSpec((tm, N), lambda i: (i, 0)),
        compiler_params=pltpu.CompilerParams(
            dimension_semantics=("parallel",),
            vmem_limit_bytes=vmem_limit),
    )(x, w, b)


def _fuse_kernel(patch_ref, labels_ref, table_ref, pos_p_ref, pos_s_ref, o_ref):
    """concat([patch, embed(labels)], -1) + pos.  patch arrives bf16 and is
    upcast here; the 16-class embedding lookup is fused in (one-hot @ resident
    table)."""
    cp = patch_ref.shape[-1]
    # Patch half: lane-aligned stores when Cp % 128 == 0 (real config Cp=1024).
    o_ref[:, :, :cp] = patch_ref[...].astype(jnp.float32) + pos_p_ref[...]

    # Semantic half: tiny one-hot matmul against the VMEM-resident table.
    p = labels_ref.shape[1]
    ncls = table_ref.shape[0]
    onehot = (jax.lax.broadcasted_iota(jnp.int32, (p, ncls), 1)
              == labels_ref[0]).astype(jnp.float32)
    sem = jnp.dot(onehot, table_ref[...], preferred_element_type=jnp.float32)
    # TODO(synk): Cs (=64 at the real config) is not a 128-lane multiple, so
    # this tail store is masked; making it lane-dense would require padding
    # sem_embed_C to 128 and paying a post-kernel slice copy of the whole
    # output, which costs more HBM traffic than the masked tail saves.
    o_ref[:, :, cp:] = sem[None] + pos_s_ref[...]


def pallas_fuse(patch, labels, table, pos_patch, pos_sem):
    """patch:(B,P,Cp) bf16, labels:(B,P,1) i32, table:(ncls,Cs) f32,
    pos_patch:(1,P,Cp) f32, pos_sem:(1,P,Cs) f32 -> (B,P,Cp+Cs) f32."""
    B, P, Cp = patch.shape
    ncls, Cs = table.shape
    C = Cp + Cs
    return pl.pallas_call(
        _fuse_kernel,
        out_shape=jax.ShapeDtypeStruct((B, P, C), jnp.float32),
        grid=(B,),
        in_specs=[
            pl.BlockSpec((1, P, Cp), lambda b: (b, 0, 0)),
            pl.BlockSpec((1, P, 1), lambda b: (b, 0, 0)),
            # Constant index maps -> table / pos slabs stay VMEM-resident
            # across the batch grid (no per-step re-DMA).
            pl.BlockSpec((ncls, Cs), lambda b: (0, 0)),
            pl.BlockSpec((1, P, Cp), lambda b: (0, 0, 0)),
            pl.BlockSpec((1, P, Cs), lambda b: (0, 0, 0)),
        ],
        out_specs=pl.BlockSpec((1, P, C), lambda b: (b, 0, 0)),
        compiler_params=pltpu.CompilerParams(
            dimension_semantics=("parallel",)),
    )(patch, labels, table, pos_patch, pos_sem)


# ---------------------------------------------------------------------------
# Plain-JAX glue (im2col, param setup, init-time positional buffers)
# ---------------------------------------------------------------------------

def im2col_nhwc(x, k, stride, pad):
    """NHWC im2col emitted directly as (B*Ho*Wo, k*k*C) in the activation's
    own dtype (bf16 on the Pallas path); no transposes.
    TODO(synk): the k*k tap expansion is still materialized in HBM; folding
    the taps into the matmul kernel needs strided manual DMA (stride-2 conv)
    and is left for a future revision."""
    B, H, W, C = x.shape
    xp = jnp.pad(x, ((0, 0), (pad, pad), (pad, pad), (0, 0)))
    Ho = (H + 2 * pad - k) // stride + 1
    Wo = (W + 2 * pad - k) // stride + 1
    taps = []
    for kh in range(k):
        for kw in range(k):
            taps.append(xp[:, kh:kh + stride * Ho:stride,
                           kw:kw + stride * Wo:stride, :])
    cols = jnp.concatenate(taps, axis=-1)          # (B, Ho, Wo, k*k*C)
    return cols.reshape(B * Ho * Wo, k * k * C), Ho, Wo


def conv2d_pallas(x_nhwc, w2d, b2d, k, stride, pad):
    """PyTorch Conv2d semantics on NHWC bf16 activations.
    w2d:(k*k*Cin, Cout) bf16 (pre-transposed at init), b2d:(1,Cout) f32."""
    B = x_nhwc.shape[0]
    cols, Ho, Wo = im2col_nhwc(x_nhwc, k, stride, pad)
    y = pallas_matmul_bias(cols, w2d, b2d)         # bf16 out
    return y.reshape(B, Ho, Wo, w2d.shape[1])      # stays channels-last, bf16


def im2col_nchw(x, k, stride, pad):
    """NCHW im2col (reference path only)."""
    B, C, H, W = x.shape
    xp = jnp.pad(x, ((0, 0), (0, 0), (pad, pad), (pad, pad)))
    Ho = (H + 2 * pad - k) // stride + 1
    Wo = (W + 2 * pad - k) // stride + 1
    taps = []
    for kh in range(k):
        for kw in range(k):
            taps.append(xp[:, :, kh:kh + stride * Ho:stride,
                           kw:kw + stride * Wo:stride])
    cols = jnp.stack(taps, axis=2)                 # (B, C, k*k, Ho, Wo)
    cols = cols.transpose(0, 3, 4, 1, 2)           # (B, Ho, Wo, C, k*k)
    return cols.reshape(B * Ho * Wo, C * k * k), Ho, Wo


def positional_encoding(input_dim, max_len):
    position = jnp.arange(max_len, dtype=jnp.float32)[:, None]
    div_term = jnp.exp(jnp.arange(0, input_dim, 2, dtype=jnp.float32)
                       * (-math.log(10000.0) / input_dim))
    pe = jnp.zeros((max_len, input_dim), dtype=jnp.float32)
    pe = pe.at[:, 0::2].set(jnp.sin(position * div_term))
    pe = pe.at[:, 1::2].set(jnp.cos(position * div_term))
    return pe[None]  # (1, max_len, input_dim)


def bilinear_resize_nchw(x, out_h, out_w):
    """F.interpolate(mode='bilinear', align_corners=False) equivalent."""
    _, _, H, W = x.shape
    ys = (jnp.arange(out_h, dtype=jnp.float32) + 0.5) * (H / out_h) - 0.5
    xs = (jnp.arange(out_w, dtype=jnp.float32) + 0.5) * (W / out_w) - 0.5
    ys = jnp.clip(ys, 0.0, H - 1)
    xs = jnp.clip(xs, 0.0, W - 1)
    y0 = jnp.floor(ys).astype(jnp.int32)
    x0 = jnp.floor(xs).astype(jnp.int32)
    y1 = jnp.minimum(y0 + 1, H - 1)
    x1 = jnp.minimum(x0 + 1, W - 1)
    wy = (ys - y0)[None, None, :, None]
    wx = (xs - x0)[None, None, None, :]
    g = lambda yi, xi: x[:, :, yi, :][:, :, :, xi]
    v00, v01 = g(y0, x0), g(y0, x1)
    v10, v11 = g(y1, x0), g(y1, x1)
    return (v00 * (1 - wy) * (1 - wx) + v01 * (1 - wy) * wx
            + v10 * wy * (1 - wx) + v11 * wy * wx)


def build_pos_embed(input_size, patch_size, total_embed_C):
    """Replicates the `self.pos_embed` buffer built in Embedding.__init__.
    Note: the `8 - 1` row index for the w/h parts is a hard-coded literal in
    the PyTorch source (independent of patch_size); reproduced verbatim."""
    D4 = total_embed_C // 4
    S = input_size
    pe = positional_encoding(D4, S)                       # shared by x/y/w/h
    px = jnp.broadcast_to(pe[:, :, None, :], (1, S, S, D4))
    py = jnp.broadcast_to(pe[:, None, :, :], (1, S, S, D4))
    pw = jnp.broadcast_to(pe[:, 8 - 1][:, None, None, :], (1, S, S, D4))
    ph = pw
    pos = jnp.concatenate([px, py, pw, ph], axis=3)       # (1, S, S, C)
    g = input_size // patch_size
    pos = bilinear_resize_nchw(pos.transpose(0, 3, 1, 2), g, g)  # (1, C, g, g)
    return pos.reshape(1, total_embed_C, g * g).transpose(0, 2, 1)  # (1, P, C)


def init_params(key, in_chans, patch_embed_C, sem_embed_C, num_sem_classes):
    """PyTorch-layout parameters (NCHW conv weights, f32)."""
    hidden_dim = patch_embed_C // in_chans
    mid = in_chans * hidden_dim // 2
    layer_defs = [
        (mid, in_chans, 3, 2, 1),
        (mid, mid, 3, 2, 1),
        (patch_embed_C, mid, 3, 2, 1),
        (patch_embed_C, patch_embed_C, 1, 1, 0),
    ]
    keys = jax.random.split(key, 2 * len(layer_defs) + 1)
    convs = []
    for i, (co, ci, k, s, p) in enumerate(layer_defs):
        w = 0.05 * jax.random.normal(keys[2 * i], (co, ci, k, k), jnp.float32)
        b = 0.05 * jax.random.normal(keys[2 * i + 1], (co,), jnp.float32)
        convs.append((w, b, s, p))
    table = 0.05 * jax.random.normal(
        keys[-1], (num_sem_classes, sem_embed_C), jnp.float32)
    return {"convs": convs, "sem_table": table}


def prepare_pallas_params(params):
    """One-time (module-init) weight prep: transpose to the im2col K order
    (kh, kw, Cin) and cast to bf16; reshape bias to (1, Cout) f32."""
    convs = []
    for (w, b, stride, pad) in params["convs"]:
        Cout, Cin, k, _ = w.shape
        w2d = (w.transpose(2, 3, 1, 0)
               .reshape(k * k * Cin, Cout).astype(jnp.bfloat16))
        convs.append((w2d, b.reshape(1, Cout).astype(jnp.float32),
                      k, stride, pad))
    return {"convs": convs, "sem_table": params["sem_table"]}


# ---------------------------------------------------------------------------
# Forward pass (Pallas) and pure-JAX reference
# ---------------------------------------------------------------------------

def embedding_forward(x_nchw, pparams, pos_patch, pos_sem, sem_labels):
    # Single NCHW->NHWC transpose + single f32->bf16 cast at the input;
    # activations stay NHWC bf16 through the whole STEM stack.
    h = jnp.transpose(x_nchw, (0, 2, 3, 1)).astype(jnp.bfloat16)
    for (w2d, b2d, k, stride, pad) in pparams["convs"]:
        h = conv2d_pallas(h, w2d, b2d, k, stride, pad)
    B, gh, gw, Cp = h.shape
    P = gh * gw
    patch = h.reshape(B, P, Cp)                    # bf16, channels-last
    labels = sem_labels.reshape(B, P, 1).astype(jnp.int32)
    return pallas_fuse(patch, labels, pparams["sem_table"], pos_patch, pos_sem)


def reference_forward(x, params, pos_embed, sem_labels):
    """Independent NCHW im2col + jnp.dot reference mirroring the kernel's
    numerical recipe (bf16 MXU inputs / activations, f32 accumulation)."""
    h = x.astype(jnp.bfloat16)
    for (w, b, stride, pad) in params["convs"]:
        Cout, Cin, k, _ = w.shape
        cols, Ho, Wo = im2col_nchw(h, k, stride, pad)
        y = jnp.dot(cols.astype(jnp.bfloat16),
                    w.reshape(Cout, -1).T.astype(jnp.bfloat16),
                    preferred_element_type=jnp.float32) + b[None, :]
        h = (y.reshape(h.shape[0], Ho, Wo, Cout)
             .transpose(0, 3, 1, 2).astype(jnp.bfloat16))
    B, Cp, gh, gw = h.shape
    patch = h.reshape(B, Cp, gh * gw).transpose(0, 2, 1).astype(jnp.float32)
    sem = params["sem_table"][sem_labels.astype(jnp.int32)]
    return jnp.concatenate([patch, sem], axis=-1) + pos_embed


# ---------------------------------------------------------------------------
# Main
# ---------------------------------------------------------------------------

if __name__ == "__main__":
    # Small config mirroring Embedding(input_size=88, patch_size=8,
    # patch_embed_C=1024, sem_embed_C=64, in_chans=256, num_sem_classes=16)
    # at reduced sizes (patch_size=8 -> STEM conv stack path).
    B = 2
    input_size = 16
    patch_size = 8
    in_chans = 8
    patch_embed_C = 32
    sem_embed_C = 32
    num_sem_classes = 16
    total_embed_C = patch_embed_C + sem_embed_C
    assert total_embed_C % 4 == 0

    key = jax.random.PRNGKey(0)
    kx, kl, kp = jax.random.split(key, 3)
    x = jax.random.normal(kx, (B, in_chans, input_size, input_size),
                          jnp.float32)
    num_patches = (input_size // patch_size) ** 2
    # TODO(synk): SegMaskToPatches (torchvision transform turning a seg mask
    # into patch-level labels) has no clean Pallas equivalent; patch-level
    # integer labels are supplied directly.
    sem_labels = jax.random.randint(kl, (B, num_patches), 0, num_sem_classes)

    params = init_params(kp, in_chans, patch_embed_C, sem_embed_C,
                         num_sem_classes)
    pparams = prepare_pallas_params(params)        # one-time weight prep
    pos_embed = build_pos_embed(input_size, patch_size, total_embed_C)
    pos_patch = pos_embed[:, :, :patch_embed_C]
    pos_sem = pos_embed[:, :, patch_embed_C:]

    out = jax.block_until_ready(
        embedding_forward(x, pparams, pos_patch, pos_sem, sem_labels))
    assert out.shape == (B, num_patches, total_embed_C), out.shape

    ref = reference_forward(x, params, pos_embed, sem_labels)
    assert jnp.allclose(out, ref, atol=5e-3, rtol=5e-3), \
        float(jnp.max(jnp.abs(out - ref)))

    print("KERNEL_OK")
</pallas_src>

<mosaic_0001>
module attributes {stable_mosaic.version = 11 : i64} {
  func.func @_matmul_bias_kernel(%arg0: i32, %arg1: memref<64x72xbf16, #tpu.memory_space<vmem>>, %arg2: memref<72x16xbf16, #tpu.memory_space<vmem>>, %arg3: memref<1x16xf32, #tpu.memory_space<vmem>>, %arg4: memref<64x16xbf16, #tpu.memory_space<vmem>>) attributes {dimension_semantics = [#tpu.dimension_semantics<parallel>], iteration_bounds = array<i64: 2>, scalar_prefetch = 0 : i64, scratch_operands = 0 : i64, tpu.core_type = #tpu.core_type<tc>, window_params = [{transform_indices = @transform_0, window_bounds = array<i64: 64, 72>}, {pipeline_mode = #tpu.pipeline_mode<synchronous>, transform_indices = @transform_1, window_bounds = array<i64: 72, 16>}, {pipeline_mode = #tpu.pipeline_mode<synchronous>, transform_indices = @transform_2, window_bounds = array<i64: 1, 16>}, {transform_indices = @transform_3, window_bounds = array<i64: 64, 16>}]} {
    %c0 = arith.constant 0 : index
    %c0_0 = arith.constant 0 : index
    %0 = vector.load %arg1[%c0, %c0_0] : memref<64x72xbf16, #tpu.memory_space<vmem>>, vector<64x72xbf16>
    %c0_1 = arith.constant 0 : index
    %c0_2 = arith.constant 0 : index
    %1 = vector.load %arg2[%c0_1, %c0_2] : memref<72x16xbf16, #tpu.memory_space<vmem>>, vector<72x16xbf16>
    %cst = arith.constant dense<0.000000e+00> : vector<64x16xf32>
    %2 = tpu.matmul %0, %1, %cst {dimension_numbers = #tpu.dot_dimension_numbers<[1], [0], [0], [1], [0, 0, 1, 1], [], []>} : vector<64x72xbf16>, vector<72x16xbf16>, vector<64x16xf32> -> vector<64x16xf32>
    %c0_3 = arith.constant 0 : index
    %c0_4 = arith.constant 0 : index
    %3 = vector.load %arg3[%c0_3, %c0_4] : memref<1x16xf32, #tpu.memory_space<vmem>>, vector<1x16xf32>
    %4 = vector.broadcast %3 : vector<1x16xf32> to vector<64x16xf32>
    %5 = arith.addf %2, %4 : vector<64x16xf32>
    %6 = arith.truncf %5 : vector<64x16xf32> to vector<64x16xbf16>
    %c0_5 = arith.constant 0 : index
    %c0_6 = arith.constant 0 : index
    %7 = vector.load %arg4[%c0_5, %c0_6] : memref<64x16xbf16, #tpu.memory_space<vmem>>, vector<64x16xbf16>
    tpu.vector_store %arg4[%c0_5, %c0_6], %6 {strides = array<i32>} : memref<64x16xbf16, #tpu.memory_space<vmem>>, vector<64x16xbf16>,
    return
  }
  func.func @transform_0(%arg0: i32) -> (i32, i32) {
    %c0_i32 = arith.constant 0 : i32
    %c0_i32_0 = arith.constant 0 : i32
    return %arg0, %c0_i32 : i32, i32
  }
  func.func @transform_1(%arg0: i32) -> (i32, i32) {
    %c0_i32 = arith.constant 0 : i32
    %c0_i32_0 = arith.constant 0 : i32
    %c0_i32_1 = arith.constant 0 : i32
    return %c0_i32, %c0_i32_0 : i32, i32
  }
  func.func @transform_2(%arg0: i32) -> (i32, i32) {
    %c0_i32 = arith.constant 0 : i32
    %c0_i32_0 = arith.constant 0 : i32
    %c0_i32_1 = arith.constant 0 : i32
    return %c0_i32, %c0_i32_0 : i32, i32
  }
  func.func @transform_3(%arg0: i32) -> (i32, i32) {
    %c0_i32 = arith.constant 0 : i32
    %c0_i32_0 = arith.constant 0 : i32
    return %arg0, %c0_i32 : i32, i32
  }
}

</mosaic_0001>

<bundles_post_ra>
// kernel: tpu_custom_call.1
= control target key start
LH: loop header
LB: loop body
LE: loop exit
PB: predicated region body
PF: predicated region fallthrough
CT: control target
= control target key end

     0   :  { %s550_s12 = smov 0   ;;  %s600_s0 = inlined_call_operand.vmem [shape: bf16[128,72], index: 0, kind: input, shape index: {}]   ;;  %s601_s1 = inlined_call_operand.vmem [shape: bf16[72,16], index: 1, kind: input, shape index: {}]   ;;  %s602_s2 = inlined_call_operand.vmem [shape: f32[1,16], index: 2, kind: input, shape index: {}]   ;;  %s603_s3 = inlined_call_operand.vmem [shape: bf16[128,16], index: 3, kind: output, shape index: {}]  }
   0x1 LB: > { %s425_s13 = sadd.s32 4294967295, %s528_s12   ;;  %p429_p0 = scmp.ge.s32.totalorder %s528_s12, 1  ;;  %s528_s12 = sphi %s550_s12, %s13_s12  }
   0x2   : > { %p138_p1 = scmp.lt.s32.totalorder %s528_s12, 3 }
   0x4   : > { %p139_p2 = pnand %p429_p0, %p138_p1 }
   0x5   : > { %s430_s18 = sshll.u32 (!%p139_p2), %s425_s13, 3 }
   0x6   : > { %142 = sbr.rel (%p139_p2) target bundleno = 236 (0xec), region = 32  ;;  %p163_p3 = scmp.lt.s32.totalorder (!%p139_p2), %s430_s18, 15 }
   0xb   : > { %v513_v0 = vld [vmem:[%s601_s1 + $0x20] ss:$0 sps:$4 sm:$0xff]   ;;  %vm259_vm0 = vcmask 1043456   ;;  %v514_v1 = vld [vmem:[%s601_s1 + $0x18] sm:$0xff]   ;;  %v515_v3 = vld [vmem:[%s601_s1 + $0x10] sm:$0xff]   ;;  %s605_s18 = smov (!%p163_p3, %s430_s18), 15 }
   0xc   : > { %503 = vmatprep.subr.msk.bf16.mxu0 %vm259_vm0, %v513_v0  ;;  %504 = vmatprep.subr.msk.bf16.mxu1 %vm259_vm0, %v513_v0  ;;  %v261_v2 = vsel %vm259_vm0, %v513_v0, 0  ;;  %v516_v4 = vld [vmem:[%s601_s1 + $0x8] sm:$0xff]   ;;  %s431_s23 = sshll.u32 %s605_s18, 2  ;;  %vm246_vm1 = vcmask 588800   ;;  %v517_v7 = vld [vmem:[%s601_s1] sm:$0xff]   ;;  %vm360_vm2 = vcmask 125952  }
   0xd   : > { %476 = vmatpush3.bf16.msra.mxu0 %v261_v2  ;;  %498 = vmatpush3.bf16.msra.mxu1 %v261_v2  ;;  %s166_s26 = scalar_lea.vmem %s600_s0, %s431_s23  ;;  %v434_v10 = vld [vmem:[%s602_s2] ss:$0 sm:$0xff]  ;;  %s172_s6 = scalar_lea.vmem %s603_s3, %s431_s23 }
   0xe   : > { %477 = vmatprep.subr.bf16.mxu0 %v514_v1  ;;  %494 = vmatprep.subr.bf16.mxu1 %v514_v1  ;;  %v518_v5 = vld [vmem:[%s166_s26] sm:$0xff]   ;;  %v519_v6 = vld [vmem:[%s166_s26 + $0x10] sm:$0xff]   ;;  %v520_v8 = vld [vmem:[%s166_s26 + $0x8] sm:$0xff]  }
   0xf   : > { %485 = vmatprep.mubr.msk.bf16.mxu0 %vm246_vm1, %v518_v5  ;;  %489 = vmatprep.mubr.msk.bf16.mxu1 %vm246_vm1, %v519_v6  ;;  %v521_v9 = vld [vmem:[%s166_s26 + $0x18] sm:$0xff]  }
  0x11   : > { %478 = vmatpush3.bf16.msra.mxu0 %v514_v1  ;;  %499 = vmatpush3.bf16.msra.mxu1 %v514_v1 }
  0x12   : > { %479 = vmatprep.subr.bf16.mxu0 %v515_v3  ;;  %495 = vmatprep.subr.bf16.mxu1 %v515_v3 }
  0x15   : > { %480 = vmatpush3.bf16.msra.mxu0 %v515_v3  ;;  %500 = vmatpush3.bf16.msra.mxu1 %v515_v3 }
  0x16   : > { %481 = vmatprep.subr.bf16.mxu0 %v516_v4  ;;  %496 = vmatprep.subr.bf16.mxu1 %v516_v4 }
  0x19   : > { %482 = vmatpush3.bf16.msra.mxu0 %v516_v4  ;;  %501 = vmatpush3.bf16.msra.mxu1 %v516_v4 }
  0x1a   : > { %483 = vmatprep.subr.bf16.mxu0 %v517_v7  ;;  %497 = vmatprep.subr.bf16.mxu1 %v517_v7 }
  0x1d   : > { %484 = vmatpush3.bf16.msra.mxu0 %v517_v7  ;;  %502 = vmatpush3.bf16.msra.mxu1 %v517_v7 }
  0x20   : > { %486 = vmatmul.mubr.msk.bf16.vlgmr.msra.gmra.mxu0 %vm246_vm1, %v520_v8  ;;  %490 = vmatmul.mubr.msk.bf16.vlgmr.msra.gmra.mxu1 %vm246_vm1, %v521_v9 }
  0xe0   : > { %v487_v11 = vpop.f32.mrf.mxu0  ;;  %v491_v12 = vpop.f32.mrf.mxu1 }
  0xe1   : > { %v306_v13 = vadd.f32 %v487_v11, %v434_v10  ;;  %v322_v14 = vadd.f32 %v491_v12, %v434_v10 }
  0xe2   : > { %v297_v15 = vpop.f32.mrf.mxu0  ;;  %v313_v16 = vpop.f32.mrf.mxu1 }
  0xe3   : > { %v460_v17 = vpack.c.bf16 %v306_v13, %v306_v13  ;;  %v464_v18 = vpack.c.bf16 %v322_v14, %v322_v14  ;;  %v298_v19 = vadd.f32 %v434_v10, %v297_v15  ;;  %v314_v20 = vadd.f32 %v434_v10, %v313_v16 }
  0xe4   : > { %v488_v21 = vpop.f32.mrf.mxu0  ;;  %v492_v22 = vpop.f32.mrf.mxu1 }
  0xe5   : > { %363 = vst.msk [vmem:[%s172_s6 + $0x8] sm:$0xf] %vm360_vm2, %v460_v17  ;;  %367 = vst.msk [vmem:[%s172_s6 + $0x18] sm:$0xf] %vm360_vm2, %v464_v18  ;;  %v458_v23 = vpack.c.bf16 %v298_v19, %v298_v19  ;;  %v462_v24 = vpack.c.bf16 %v314_v20, %v314_v20  ;;  %v309_v25 = vadd.f32 %v488_v21, %v434_v10 }
  0xe6   : > { %v325_v26 = vadd.f32 %v492_v22, %v434_v10  ;;  %v300_v27 = vpop.f32.mrf.mxu0  ;;  %v316_v28 = vpop.f32.mrf.mxu1 }
  0xe7   : > { %361 = vst.msk [vmem:[%s172_s6] sm:$0xf] %vm360_vm2, %v458_v23  ;;  %365 = vst.msk [vmem:[%s172_s6 + $0x10] sm:$0xf] %vm360_vm2, %v462_v24  ;;  %v461_v29 = vpack.c.bf16 %v309_v25, %v309_v25  ;;  %v301_v31 = vadd.f32 %v434_v10, %v300_v27  ;;  %v317_v32 = vadd.f32 %v434_v10, %v316_v28 }
  0xe8   : > { %v465_v30 = vpack.c.bf16 %v325_v26, %v325_v26 }
  0xe9   : > { %364 = vst.msk [vmem:[%s172_s6 + $0xc] sm:$0xf] %vm360_vm2, %v461_v29  ;;  %v459_v33 = vpack.c.bf16 %v301_v31, %v301_v31  ;;  %v463_v34 = vpack.c.bf16 %v317_v32, %v317_v32 }
  0xea   : > { %368 = vst.msk [vmem:[%s172_s6 + $0x1c] sm:$0xf] %vm360_vm2, %v465_v30 }
  0xeb   : > { %362 = vst.msk [vmem:[%s172_s6 + $0x4] sm:$0xf] %vm360_vm2, %v459_v33  ;;  %366 = vst.msk [vmem:[%s172_s6 + $0x14] sm:$0xf] %vm360_vm2, %v463_v34 }
  0xec PF: > { %s13_s12 = sadd.s32 1, %s528_s12  }
  0xed   : > { %p10_p4 = scmp.ge.s32.totalorder %s13_s12, 4  }
  0xef   :  { %12 = sbr.rel (!%p10_p4) target bundleno = 1 (0x1), region = 62 }

</bundles_post_ra>
